<compile_context>
chip_gen: v7x
topology: tpu7x:2x2x1
jax: 0.10.0
libtpu: 0.0.40
codegen_flags: <defaults>
</compile_context>

<pallas_src>
import functools
import math

import jax
import jax.numpy as jnp
from jax import lax
from jax.experimental import pallas as pl
from jax.experimental.pallas import tpu as pltpu


def _rbn_kernel(scal_ref, chan_ref, x_ref, o_ref, new_stat_ref, *, mom1, eps):
    # x block: (N, C, HW) f32, fully resident in VMEM.
    x = x_ref[...]

    # Packed per-channel state/params: columns = [sums, sqrs, mults, adds].
    sums = chan_ref[:, 0:1]           # (C, 1)
    sqrs = chan_ref[:, 1:2]           # (C, 1)
    mults = chan_ref[:, 2:3]          # (C, 1)
    adds = chan_ref[:, 3:4]           # (C, 1)

    # Packed scalars (SMEM): [1/dbias_eff, 1/count_debiased, clamp_flag].
    inv_db = scal_ref[0]
    inv_c = scal_ref[1]
    clamp_flag = scal_ref[2]

    # Batch statistics: per-channel sum and sum-of-squares over (N, HW).
    # Lane reduction first (XLU), then the tiny cross-batch add over N pages.
    s = jnp.sum(jnp.sum(x, axis=2, keepdims=True), axis=0)          # (C, 1)
    ss = jnp.sum(jnp.sum(x * x, axis=2, keepdims=True), axis=0)     # (C, 1)

    # Running-stat lerp (mom1 == 0.0 in eval mode => stats pass through unchanged).
    new_sums = sums + mom1 * (s - sums)                              # (C, 1)
    new_sqrs = sqrs + mom1 * (ss - sqrs)                             # (C, 1)

    new_stat_ref[:, 0:1] = new_sums
    new_stat_ref[:, 1:2] = new_sqrs

    # Debiased moments -> per-channel affine (scale, shift).
    means = (new_sums * inv_db) * inv_c                              # (C, 1)
    ex2 = (new_sqrs * inv_db) * inv_c                                # (C, 1)
    var = ex2 - means * means
    var = jnp.where(clamp_flag > 0.5, jnp.maximum(var, 0.01), var)

    scale = mults * lax.rsqrt(var + eps)                             # (C, 1), EUP rsqrt
    shift = adds - means * scale                                     # (C, 1)

    # Lane-dense normalize + store: (1, C, 1) broadcasts over (N, C, HW).
    o_ref[...] = x * scale[None] + shift[None]


def running_batch_norm(x_nchw, params, state, *, mom=0.1, eps=1e-5, training=True):
    """Functional RunningBatchNorm forward.

    x_nchw: (N, C, H, W) f32.
    params: (mults, adds), each (C,).
    state:  (sums, sqrs, count, dbias, batch, step) — (C,), (C,), 4 scalars.
    Returns (out (N, C, H, W), new_state).
    """
    mults, adds = params
    sums, sqrs, count, dbias, batch, step = state
    N, C, H, W = x_nchw.shape
    HW = H * W

    # Free layout change: NCHW -> (N, C, HW). Channels stay on sublanes, HW on lanes.
    x3 = x_nchw.reshape(N, C, HW).astype(jnp.float32)

    if training:
        # Module computes mom1 = 1 - (1-mom)/sqrt(bs-1); assumes bs >= 2.
        mom1 = 1.0 - (1.0 - mom) / math.sqrt(N - 1)
        n_per_ch = float(N * HW)                        # x.numel() / nc
        new_count = count + mom1 * (n_per_ch - count)
        new_dbias = dbias * (1.0 - mom1) + mom1
        new_batch = batch + float(N)
        new_step = step + 1.0
    else:
        mom1 = 0.0
        new_count, new_dbias, new_batch, new_step = count, dbias, batch, step

    # Debias coefficients (the `if step < 100` / `if batch < 20` branches of the module).
    db = jnp.where(new_step < 100.0, new_dbias, jnp.float32(1.0))
    inv_db = 1.0 / db
    inv_c = 1.0 / (new_count * inv_db)                  # 1 / debiased count
    clamp_flag = (new_batch < 20.0).astype(jnp.float32)

    scal = jnp.stack([inv_db, inv_c, clamp_flag]).astype(jnp.float32)          # (3,)
    chan = jnp.stack([sums, sqrs, mults, adds], axis=1).astype(jnp.float32)    # (C, 4)

    out3, new_stat = pl.pallas_call(
        functools.partial(_rbn_kernel, mom1=float(mom1), eps=float(eps)),
        out_shape=(
            jax.ShapeDtypeStruct((N, C, HW), jnp.float32),   # normalized x
            jax.ShapeDtypeStruct((C, 2), jnp.float32),       # [new_sums, new_sqrs]
        ),
        in_specs=[
            pl.BlockSpec(memory_space=pltpu.MemorySpace.SMEM),   # packed scalars
            pl.BlockSpec(memory_space=pltpu.MemorySpace.VMEM),   # packed per-channel
            pl.BlockSpec(memory_space=pltpu.MemorySpace.VMEM),   # x
        ],
        out_specs=(
            pl.BlockSpec(memory_space=pltpu.MemorySpace.VMEM),
            pl.BlockSpec(memory_space=pltpu.MemorySpace.VMEM),
        ),
    )(scal, chan, x3)

    new_state = (new_stat[:, 0], new_stat[:, 1], new_count, new_dbias, new_batch, new_step)
    return out3.reshape(N, C, H, W), new_state


def _ref_forward(x, mults, adds, state, mom=0.1, eps=1e-5, training=True):
    """Pure-JAX reference mirroring the PyTorch module line by line."""
    sums, sqrs, count, dbias, batch, step = state
    N, C, H, W = x.shape
    sums4 = sums.reshape(1, C, 1, 1)
    sqrs4 = sqrs.reshape(1, C, 1, 1)
    if training:
        s = jnp.sum(x, axis=(0, 2, 3), keepdims=True)
        ss = jnp.sum(x * x, axis=(0, 2, 3), keepdims=True)
        c = float(x.size) / C
        mom1 = 1.0 - (1.0 - mom) / math.sqrt(N - 1)
        sums4 = sums4 + mom1 * (s - sums4)
        sqrs4 = sqrs4 + mom1 * (ss - sqrs4)
        count = count + mom1 * (c - count)
        dbias = dbias * (1.0 - mom1) + mom1
        batch = batch + float(N)
        step = step + 1.0
    lt100 = step < 100.0
    sums_d = jnp.where(lt100, sums4 / dbias, sums4)
    sqrs_d = jnp.where(lt100, sqrs4 / dbias, sqrs4)
    c_d = jnp.where(lt100, count / dbias, count)
    means = sums_d / c_d
    vars_ = sqrs_d / c_d - means * means
    vars_ = jnp.where(batch < 20.0, jnp.maximum(vars_, 0.01), vars_)
    out = (x - means) / jnp.sqrt(vars_ + eps) * mults.reshape(1, C, 1, 1) \
        + adds.reshape(1, C, 1, 1)
    new_state = (sums4.reshape(C), sqrs4.reshape(C), count, dbias, batch, step)
    return out, new_state


if __name__ == "__main__":
    N, C, H, W = 2, 4, 16, 16
    key = jax.random.PRNGKey(0)
    k1, k2, k3, k4 = jax.random.split(key, 4)

    x1 = jax.random.normal(k1, (N, C, H, W), jnp.float32)
    x2 = 0.5 + 1.5 * jax.random.normal(k4, (N, C, H, W), jnp.float32)
    mults = 1.0 + 0.1 * jax.random.normal(k2, (C,), jnp.float32)
    adds = 0.1 * jax.random.normal(k3, (C,), jnp.float32)

    # Fresh-module buffer state (matches register_buffer initial values).
    state0 = (jnp.zeros((C,), jnp.float32), jnp.zeros((C,), jnp.float32),
              jnp.float32(0.0), jnp.float32(0.0), jnp.float32(0.0), jnp.float32(0.0))

    # Two consecutive training-mode forward passes (exercises the running-stat lerp).
    out1, st1 = running_batch_norm(x1, (mults, adds), state0, training=True)
    out2, st2 = running_batch_norm(x2, (mults, adds), st1, training=True)
    out2 = jax.block_until_ready(out2)

    ref1, rst1 = _ref_forward(x1, mults, adds, state0, training=True)
    ref2, rst2 = _ref_forward(x2, mults, adds, rst1, training=True)

    assert out1.shape == (N, C, H, W), out1.shape
    assert jnp.allclose(out1, ref1, atol=2e-4, rtol=1e-4), \
        f"step1 max err {jnp.max(jnp.abs(out1 - ref1))}"
    assert jnp.allclose(out2, ref2, atol=2e-4, rtol=1e-4), \
        f"step2 max err {jnp.max(jnp.abs(out2 - ref2))}"
    # Running-stat buffers after two steps.
    assert jnp.allclose(st2[0], rst2[0], atol=1e-3, rtol=1e-4), "sums mismatch"
    assert jnp.allclose(st2[1], rst2[1], atol=1e-3, rtol=1e-4), "sqrs mismatch"
    for a, b, name in zip(st2[2:], rst2[2:], ("count", "dbias", "batch", "step")):
        assert jnp.allclose(a, b, atol=1e-4, rtol=1e-5), f"{name} mismatch"

    print("KERNEL_OK")
</pallas_src>

<mosaic_0001>
module attributes {stable_mosaic.version = 11 : i64} {
  func.func @_rbn_kernel(%arg0: memref<3xf32, #tpu.memory_space<smem>>, %arg1: memref<4x4xf32, #tpu.memory_space<vmem>>, %arg2: memref<2x4x256xf32, #tpu.memory_space<vmem>>, %arg3: memref<2x4x256xf32, #tpu.memory_space<vmem>>, %arg4: memref<4x2xf32, #tpu.memory_space<vmem>>) attributes {dimension_semantics = [], scalar_prefetch = 0 : i64, scratch_operands = 0 : i64, tpu.core_type = #tpu.core_type<tc>} {
    %c0 = arith.constant 0 : index
    %c0_0 = arith.constant 0 : index
    %c0_1 = arith.constant 0 : index
    %0 = vector.load %arg2[%c0, %c0_0, %c0_1] : memref<2x4x256xf32, #tpu.memory_space<vmem>>, vector<2x4x256xf32>
    %c0_2 = arith.constant 0 : index
    %c0_3 = arith.constant 0 : index
    %1 = vector.load %arg1[%c0_2, %c0_3] : memref<4x4xf32, #tpu.memory_space<vmem>>, vector<4x1xf32>
    %c0_4 = arith.constant 0 : index
    %c1 = arith.constant 1 : index
    %2 = vector.load %arg1[%c0_4, %c1] : memref<4x4xf32, #tpu.memory_space<vmem>>, vector<4x1xf32>
    %c0_5 = arith.constant 0 : index
    %c2 = arith.constant 2 : index
    %3 = vector.load %arg1[%c0_5, %c2] : memref<4x4xf32, #tpu.memory_space<vmem>>, vector<4x1xf32>
    %c0_6 = arith.constant 0 : index
    %c3 = arith.constant 3 : index
    %4 = vector.load %arg1[%c0_6, %c3] : memref<4x4xf32, #tpu.memory_space<vmem>>, vector<4x1xf32>
    %c0_7 = arith.constant 0 : index
    %5 = memref.load %arg0[%c0_7] : memref<3xf32, #tpu.memory_space<smem>>
    %c1_8 = arith.constant 1 : index
    %6 = memref.load %arg0[%c1_8] : memref<3xf32, #tpu.memory_space<smem>>
    %c2_9 = arith.constant 2 : index
    %7 = memref.load %arg0[%c2_9] : memref<3xf32, #tpu.memory_space<smem>>
    %cst = arith.constant dense<0.000000e+00> : vector<2x4xf32>
    %8 = vector.multi_reduction <add>, %0, %cst [2] : vector<2x4x256xf32> to vector<2x4xf32>
    %9 = vector.shape_cast %8 : vector<2x4xf32> to vector<2x4x1xf32>
    %cst_10 = arith.constant dense<0.000000e+00> : vector<4x1xf32>
    %10 = vector.multi_reduction <add>, %9, %cst_10 [0] : vector<2x4x1xf32> to vector<4x1xf32>
    %11 = arith.mulf %0, %0 : vector<2x4x256xf32>
    %cst_11 = arith.constant dense<0.000000e+00> : vector<2x4xf32>
    %12 = vector.multi_reduction <add>, %11, %cst_11 [2] : vector<2x4x256xf32> to vector<2x4xf32>
    %13 = vector.shape_cast %12 : vector<2x4xf32> to vector<2x4x1xf32>
    %cst_12 = arith.constant dense<0.000000e+00> : vector<4x1xf32>
    %14 = vector.multi_reduction <add>, %13, %cst_12 [0] : vector<2x4x1xf32> to vector<4x1xf32>
    %15 = arith.subf %10, %1 : vector<4x1xf32>
    %cst_13 = arith.constant 1.000000e-01 : f32
    %16 = vector.broadcast %cst_13 : f32 to vector<4x1xf32>
    %17 = arith.mulf %16, %15 : vector<4x1xf32>
    %18 = arith.addf %1, %17 : vector<4x1xf32>
    %19 = arith.subf %14, %2 : vector<4x1xf32>
    %cst_14 = arith.constant 1.000000e-01 : f32
    %20 = vector.broadcast %cst_14 : f32 to vector<4x1xf32>
    %21 = arith.mulf %20, %19 : vector<4x1xf32>
    %22 = arith.addf %2, %21 : vector<4x1xf32>
    %c0_15 = arith.constant 0 : index
    %c0_16 = arith.constant 0 : index
    %23 = vector.load %arg4[%c0_15, %c0_16] : memref<4x2xf32, #tpu.memory_space<vmem>>, vector<4x1xf32>
    tpu.vector_store %arg4[%c0_15, %c0_16], %18 {strides = array<i32>} : memref<4x2xf32, #tpu.memory_space<vmem>>, vector<4x1xf32>,
    %c0_17 = arith.constant 0 : index
    %c1_18 = arith.constant 1 : index
    %24 = vector.load %arg4[%c0_17, %c1_18] : memref<4x2xf32, #tpu.memory_space<vmem>>, vector<4x1xf32>
    tpu.vector_store %arg4[%c0_17, %c1_18], %22 {strides = array<i32>} : memref<4x2xf32, #tpu.memory_space<vmem>>, vector<4x1xf32>,
    %25 = vector.broadcast %5 : f32 to vector<4x1xf32>
    %26 = arith.mulf %18, %25 : vector<4x1xf32>
    %27 = vector.broadcast %6 : f32 to vector<4x1xf32>
    %28 = arith.mulf %26, %27 : vector<4x1xf32>
    %29 = vector.broadcast %5 : f32 to vector<4x1xf32>
    %30 = arith.mulf %22, %29 : vector<4x1xf32>
    %31 = vector.broadcast %6 : f32 to vector<4x1xf32>
    %32 = arith.mulf %30, %31 : vector<4x1xf32>
    %33 = arith.mulf %28, %28 : vector<4x1xf32>
    %34 = arith.subf %32, %33 : vector<4x1xf32>
    %cst_19 = arith.constant 5.000000e-01 : f32
    %35 = arith.cmpf ogt, %7, %cst_19 : f32
    %cst_20 = arith.constant 0.00999999977 : f32
    %36 = vector.broadcast %cst_20 : f32 to vector<4x1xf32>
    %37 = arith.maximumf %34, %36 : vector<4x1xf32>
    %38 = arith.select %35, %37, %34 : vector<4x1xf32>
    %cst_21 = arith.constant 9.99999974E-6 : f32
    %39 = vector.broadcast %cst_21 : f32 to vector<4x1xf32>
    %40 = arith.addf %38, %39 : vector<4x1xf32>
    %41 = math.rsqrt %40 : vector<4x1xf32>
    %42 = arith.mulf %3, %41 : vector<4x1xf32>
    %43 = arith.mulf %28, %42 : vector<4x1xf32>
    %44 = arith.subf %4, %43 : vector<4x1xf32>
    %45 = vector.shape_cast %42 : vector<4x1xf32> to vector<1x4x1xf32>
    %46 = vector.broadcast %45 : vector<1x4x1xf32> to vector<2x4x256xf32>
    %47 = arith.mulf %0, %46 : vector<2x4x256xf32>
    %48 = vector.shape_cast %44 : vector<4x1xf32> to vector<1x4x1xf32>
    %49 = vector.broadcast %48 : vector<1x4x1xf32> to vector<2x4x256xf32>
    %50 = arith.addf %47, %49 : vector<2x4x256xf32>
    %c0_22 = arith.constant 0 : index
    %c0_23 = arith.constant 0 : index
    %c0_24 = arith.constant 0 : index
    %51 = vector.load %arg3[%c0_22, %c0_23, %c0_24] : memref<2x4x256xf32, #tpu.memory_space<vmem>>, vector<2x4x256xf32>
    tpu.vector_store %arg3[%c0_22, %c0_23, %c0_24], %50 {strides = array<i32>} : memref<2x4x256xf32, #tpu.memory_space<vmem>>, vector<2x4x256xf32>,
    return
  }
}

</mosaic_0001>

<bundles_post_ra>
// kernel: tpu_custom_call.1
= control target key start
LH: loop header
LB: loop body
LE: loop exit
PB: predicated region body
PF: predicated region fallthrough
CT: control target
= control target key end

     0   :  { %10 = vsyncpa [#allocation5], 0  ;;  %s428_s0 = inlined_call_operand.hbm [shape: f32[3], index: 0, kind: input, shape index: {}]   ;;  %s429_s1 = inlined_call_operand.hbm [shape: f32[4,4], index: 1, kind: input, shape index: {}]   ;;  %s430_s2 = inlined_call_operand.hbm [shape: f32[2,4,256], index: 2, kind: input, shape index: {}]   ;;  %s431_s3 = inlined_call_operand.hbm [shape: f32[2,4,256], index: 3, kind: output, shape index: {0}]   ;;  %s432_s4 = inlined_call_operand.vmem [shape: f32[4,2], index: 4, kind: output, shape index: {1}]  }
   0x1   :  { %11 = vsyncpa [#allocation3], 0 }
   0x2   :  { %12 = vsyncpa [#allocation8], 0 }
   0x3   :  { %13 = vsyncpa [#allocation4], 0  ;;  %s219_s17 = scalar_lea.hbm %s428_s0, 16 }
   0x4   :  { %p220_p0 = scmp.ne.s32.totalorder %s428_s0, %s219_s17  ;;  %p223_p1 = scmp.lt.u32.totalorder %s219_s17, %s428_s0 }
   0x6   :  { %p225_p2 = pnand %p223_p1, %p220_p0 }
   0x8   :  { %228 = shalt.err (!%p225_p2)
}
   0x9   :  { %s303_s22 = smov [#allocation2]   ;;  %s304_s25 = smov [#allocation6]  }
   0xa   :  { %21 = dma.hbm_to_smem %s428_s0, 16, %s303_s22, [#allocation5]  }
   0xb   :  { %s28_s26 = sshll.u32 %s304_s25, 4  ;;  %s305_s27 = smov [#allocation7]   ;;  %s29_s26 = int_to_ptr.vmem [resolvable:$true] %s28_s26 }
   0xc   :  { %s37_s28 = sshll.u32 %s305_s27, 4  ;;  %s229_s5 = scalar_lea.hbm %s429_s1, 64  ;;  %s38_s28 = int_to_ptr.vmem [resolvable:$true] %s37_s28 }
   0xd   :  { %p230_p3 = scmp.ne.s32.totalorder %s429_s1, %s229_s5  ;;  %p233_p4 = scmp.lt.u32.totalorder %s229_s5, %s429_s1 }
   0xf   :  { %p235_p5 = pnand %p233_p4, %p230_p3 }
  0x11   :  { %238 = shalt.err (!%p235_p5)
}
  0x12   :  { %s239_s0 = scalar_lea.vmem %s29_s26, 64  ;;  %p244_p7 = scmp.lt.s32.totalorder %s29_s26, %s29_s26 }
  0x13   :  { %p240_p6 = scmp.ne.s32.totalorder %s29_s26, %s239_s0  ;;  %p245_p8 = scmp.lt.s32.totalorder %s239_s0, %s239_s0 }
  0x15   :  { %p246_p9 = por %p245_p8, %p244_p7 }
  0x17   :  { %p247_p10 = pnand %p246_p9, %p240_p6 }
  0x19   :  { %250 = shalt.err (!%p247_p10)
}
  0x1a   :  { %31 = dma.hbm_to_vmem [thread:$0]  %s429_s1, 64, %s29_s26, [#allocation3]  }
  0x1b   :  { %s251_s14 = scalar_lea.hbm %s430_s2, 256 }
  0x1c   :  { %p252_p11 = scmp.ne.s32.totalorder %s430_s2, %s251_s14  ;;  %p255_p12 = scmp.lt.u32.totalorder %s251_s14, %s430_s2 }
  0x1e   :  { %p257_p13 = pnand %p255_p12, %p252_p11 }
  0x20   :  { %260 = shalt.err (!%p257_p13)
}
  0x21   :  { %s261_s19 = scalar_lea.vmem %s38_s28, 256  ;;  %p266_p1 = scmp.lt.s32.totalorder %s38_s28, %s38_s28 }
  0x22   :  { %p262_p0 = scmp.ne.s32.totalorder %s38_s28, %s261_s19  ;;  %p267_p2 = scmp.lt.s32.totalorder %s261_s19, %s261_s19 }
  0x24   :  { %p268_p3 = por %p267_p2, %p266_p1 }
  0x26   :  { %p269_p4 = pnand %p268_p3, %p262_p0 }
  0x28   :  { %272 = shalt.err (!%p269_p4)
}
  0x29   :  { %s306_s1 = smov 128   ;;  %s307_s20 = smov 8  }
  0x2a   :  { %43 = dma.hbm_to_vmem [thread:$0]  %s430_s2, 256, %s38_s28, [#allocation8], %s306_s1, %s306_s1, %s307_s20  }
  0x2b   :  { %295 = dma.done.wait [#allocation5], 16  }
  0x2c   :  { %296 = vsyncadd [#allocation5], 4294967280 }
  0x2d   :  { %297 = dma.done.wait [#allocation3], 64  }
  0x2e   :  { %298 = vsyncadd [#allocation3], 4294967232 }
  0x2f   :  { %299 = dma.done.wait [#allocation8], 256  }
  0x30   :  { %300 = vsyncadd [#allocation8], 4294967040 }
  0x31   :  { %53 = sfence }
  0x32   :  { %v379_v0 = vld [vmem:[#allocation7] sm:$0xff]  ;;  %vm66_vm0 = vcmask 1043456   ;;  %v381_v1 = vld [vmem:[#allocation7 + $0x8] sm:$0xff]  ;;  %s57_s2 = sld [smem:[#allocation2]]  ;;  %v56_v24 = vld [vmem:[#allocation6] sm:$0xf]  ;;  %v152_v61 = vlaneseq }
  0x33   :  { %v62_v2 = vcombine.high %v379_v0, %v379_v0  ;;  %v67_v3 = vsel %vm66_vm0, %v379_v0, 0.0  ;;  %v63_v4 = vcombine.high %v381_v1, %v381_v1  ;;  %v80_v5 = vmul.f32 %v379_v0, %v379_v0  ;;  %s198_s23 = sld [smem:[#allocation2 + $0x1]]  ;;  %s308_s28 = smov 1  }
  0x34   :  { %v81_v6 = vmul.f32 %v381_v1, %v381_v1  ;;  %v72_v8 = vsel %vm66_vm0, %v381_v1, 0.0  ;;  %vm107_vm1 = vcmask 3072   ;;  %vm109_vm2 = vcmask 11272   ;;  %s199_s29 = sld [smem:[#allocation2 + $0x2]]  ;;  %s312_s5 = smov 3  }
  0x35   :  { %v68_v7 = vsel %vm66_vm0, %v62_v2, 0.0  ;;  %v73_v9 = vsel %vm66_vm0, %v63_v4, 0.0  ;;  %v84_v11 = vcombine.high %v80_v5, %v80_v5  ;;  %v88_v12 = vsel %vm66_vm0, %v80_v5, 0.0  ;;  %s314_s6 = smov [#allocation9]  }
  0x36   :  { %v69_v10 = vadd.f32 %v68_v7, %v67_v3  ;;  %v85_v13 = vcombine.high %v81_v6, %v81_v6  ;;  %v74_v14 = vadd.f32 %v73_v9, %v72_v8  ;;  %v93_v16 = vsel %vm66_vm0, %v81_v6, 0.0  ;;  %s180_s7 = sshll.u32 %s314_s6, 4  ;;  %s181_s7 = int_to_ptr.vmem [resolvable:$true] %s180_s7 }
  0x37   :  { %v89_v15 = vsel %vm66_vm0, %v84_v11, 0.0  ;;  %v309_v50 = vmov 2   ;;  %v311_v54 = vmov 3   ;;  %v313_v59 = vmov 839922192   ;;  %s273_s8 = scalar_lea.vmem %s181_s7, 256  ;;  %p278_p7 = scmp.lt.s32.totalorder %s181_s7, %s181_s7 }
  0x38   :  { %70 = vadd.xlane.f32.xlu0 %v69_v10  ;;  %v90_v17 = vadd.f32 %v89_v15, %v88_v12  ;;  %v94_v18 = vsel %vm66_vm0, %v85_v13, 0.0  ;;  %v111_v33 = vstv %s57_s2  ;;  %213 = vset.pattern.permute.xlu1 %v311_v54  ;;  %v150_v60 = vunpack.c.l.s4 %v313_v59  ;;  %p274_p6 = scmp.ne.s32.totalorder %s181_s7, %s273_s8  ;;  %p279_p8 = scmp.lt.s32.totalorder %s273_s8, %s273_s8 }
  0x39   :  { %v95_v19 = vadd.f32 %v94_v18, %v93_v16  ;;  %v113_v36 = vstv %s198_s23  ;;  %212 = vset.pattern.permute.xlu0 %v309_v50  ;;  %v153_v63 = vshrl.u32 %v152_v61, 7 }
  0x3a   :  { %91 = vadd.xlane.f32.xlu1 %v90_v17  ;;  %p123_p5 = scmp.gt.f32.partialorder %s199_s29, 0.5  ;;  %v151_v62 = vunpack.c.0.s8 %v150_v60  ;;  %p280_p9 = por %p279_p8, %p278_p7 }
  0x3c   :  { %75 = vadd.xlane.f32.xlu0 %v74_v14  ;;  %s125_s30 = scalar_select %p123_p5, 1, 0  ;;  %v154_v2 = vsub.s32 %v151_v62, %v153_v63 }
  0x3d   :  { %p281_p10 = pnand %p280_p9, %p274_p6 }
  0x3e   :  { %96 = vadd.xlane.f32.xlu1 %v95_v19  ;;  %v126_v44 = vstv %s125_s30 }
  0x3f   :  { %vm127_vm3 = vcmp.eq.s32.totalorder %v126_v44, 1 }
  0xc5   :  { %v71_v20 = vpop.xlane.xlu0 %70 }
  0xc6   :  { %v77_v23 = vsel %vm66_vm0, %v71_v20, 0.0 }
  0xc7   :  { %v92_v21 = vpop.xlane.xlu1 %91 }
  0xc8   :  { %v98_v27 = vsel %vm66_vm0, %v92_v21, 0.0 }
  0xc9   :  { %v76_v22 = vpop.xlane.xlu0 %75 }
  0xca   :  { %v78_v25 = vsel %vm66_vm0, %v76_v22, 0.0 }
  0xcb   :  { %v79_v26 = vadd.f32 %v78_v25, %v77_v23  ;;  %v97_v28 = vpop.xlane.xlu1 %96 }
  0xcc   :  { %v99_v30 = vsel %vm66_vm0, %v97_v28, 0.0 }
  0xcd   :  { %v101_v29 = vsub.f32 %v79_v26, %v56_v24  ;;  %v100_v31 = vadd.f32 %v99_v30, %v98_v27 }
  0xcf   :  { %v102_v32 = vmul.f32 0.1, %v101_v29  ;;  %v104_v34 = vsub.f32 %v100_v31, %v56_v24 }
  0xd1   :  { %v103_v35 = vadd.f32 %v102_v32, %v56_v24  ;;  %v105_v37 = vmul.f32 0.1, %v104_v34 }
  0xd3   :  { %108 = vst.msk [vmem:[%s432_s4] sm:$0xf] %vm107_vm1, %v103_v35  ;;  %v112_v38 = vmul.f32 %v111_v33, %v103_v35  ;;  %v106_v39 = vadd.f32 %v105_v37, %v56_v24 }
  0xd5   :  { %v114_v40 = vmul.f32 %v113_v36, %v112_v38  ;;  %110 = vst.msk [vmem:[%s432_s4] sm:$0xf] %vm109_vm2, %v106_v39  ;;  %v115_v41 = vmul.f32 %v111_v33, %v106_v39  ;;  %s310_s4 = smov 126  }
  0xd7   :  { %v117_v42 = vmul.f32 %v114_v40, %v114_v40  ;;  %v116_v43 = vmul.f32 %v115_v41, %v113_v36 }
  0xd9   :  { %119 = vrot.lane.b32.xlu0 %v117_v42, %s308_s28 }
 0x14b   :  { %v120_v45 = vpop.permute.xlu0 %119 }
 0x14c   :  { %v122_v46 = vsub.f32 %v116_v43, %v120_v45 }
 0x14e   :  { %v124_v47 = vmax.f32 %v122_v46, 0.01 }
 0x150   :  { %v128_v48 = vsel %vm127_vm3, %v124_v47, %v122_v46 }
 0x151   :  { %v129_v49 = vadd.f32 1e-05, %v128_v48 }
 0x153   :  { %217 = vrsqrt.f32 %v129_v49 }
 0x15d   :  { %v218_v51 = vpop.eup %217 }
 0x15e   :  { %132 = vrot.lane.b32.xlu1 %v218_v51, %s308_s28 }
 0x1d0   :  { %v133_v52 = vpop.permute.xlu1 %132 }
 0x1d1   :  { %v135_v53 = vmul.f32 %v133_v52, %v56_v24 }
 0x1d3   :  { %147 = vperm.xlu0 %212, %v135_v53   ;;  %137 = vrot.lane.b32.xlu1 %v135_v53, %s310_s4 }
 0x1d7   :  { %214 = vset.pattern.permute.xlu0 %v311_v54 }
 0x245   :  { %v138_v55 = vpop.permute.xlu1 %137 }
 0x246   :  { %v140_v56 = vmul.f32 %v138_v55, %v114_v40 }
 0x248   :  { %142 = vrot.lane.b32.xlu1 %v140_v56, %s312_s5 }
 0x252   :  { %v148_v3 = vpop.permute.xlu0 %147 }
 0x253   :  { %v155_v4 = vrot.slane %v148_v3, %v154_v2 }
 0x255   :  { %v157_v6 = vmul.f32 %v155_v4, %v379_v0  ;;  %v158_v7 = vmul.f32 %v155_v4, %v381_v1 }
 0x2ba   :  { %v143_v57 = vpop.permute.xlu1 %142 }
 0x2bb   :  { %v145_v58 = vsub.f32 %v56_v24, %v143_v57 }
 0x2bd   :  { %161 = vperm.xlu1 %213, %v145_v58  }
 0x33c   :  { %v162_v5 = vpop.permute.xlu1 %161 }
 0x33d   :  { %v169_v8 = vrot.slane %v162_v5, %v154_v2 }
 0x33f   :  { %v171_v9 = vadd.f32 %v169_v8, %v157_v6  ;;  %v172_v10 = vadd.f32 %v169_v8, %v158_v7 }
 0x341   :  { %173 = vst [vmem:[#allocation9] sm:$0xff] %v171_v9  ;;  %174 = vst [vmem:[#allocation9 + $0x8] sm:$0xff] %v172_v10 }
 0x342   :  { %284 = shalt.err (!%p281_p10)
}
 0x343   :  { %s285_s10 = scalar_lea.hbm %s431_s3, 256 }
 0x344   :  { %p286_p11 = scmp.ne.s32.totalorder %s431_s3, %s285_s10  ;;  %p289_p12 = scmp.lt.u32.totalorder %s285_s10, %s431_s3 }
 0x346   :  { %p291_p13 = pnand %p289_p12, %p286_p11 }
 0x348   :  { %294 = shalt.err (!%p291_p13)
}
 0x349   :  { %186 = dma.vmem_to_hbm [thread:$0]  %s181_s7, 256, %s431_s3, [#allocation4], %s306_s1, %s306_s1, %s307_s20  }
 0x34a   :  { %301 = dma.done.wait [#allocation4], 256  }
 0x34b   :  { %302 = vsyncadd [#allocation4], 4294967040 }
 0x34c   :  { %194 = vsyncpa [#allocation3], 1 }
 0x34d   :  { %195 = vsyncpa [#allocation8], 1 }
 0x34e   :  { %196 = vsyncpa [#allocation4], 1 }
 0x34f   :  { %197 = vsyncpa [#allocation5], 1 }

</bundles_post_ra>
